<compile_context>
chip_gen: v7x
topology: tpu7x:2x2x1
jax: 0.10.0
libtpu: 0.0.40
codegen_flags: <defaults>
</compile_context>

<pallas_src>
import math

import jax
import jax.numpy as jnp
import numpy as np
from jax import lax
from jax.experimental import pallas as pl
from jax.experimental.pallas import tpu as pltpu

EPS = 1e-5
NEG_INF = -1e30                      # finite "minus infinity" (NaN-safe masking)
_VMEM_LIMIT = 48 * 1024 * 1024       # TODO(synk): re-derive per generation/shape


def _round_up(x, m):
    return (x + m - 1) // m * m


def _layernorm(x, w, b):
    # x: (rows, D), w/b: (1, D); PyTorch LayerNorm (biased variance, eps=1e-5)
    mean = jnp.mean(x, axis=-1, keepdims=True)
    xc = x - mean
    var = jnp.mean(xc * xc, axis=-1, keepdims=True)
    return xc * lax.rsqrt(var + EPS) * w + b


def _invariant_spec(shape, index_map):
    """Grid-invariant parameter block: fetched once (constant index_map) and
    single-buffered so it does not double its VMEM footprint."""
    try:
        return pl.BlockSpec(shape, index_map, pipeline_mode=pl.Buffered(1))
    except TypeError:  # pipeline_mode kwarg unavailable -> default buffering
        return pl.BlockSpec(shape, index_map)


# --------------------------------------------------------------------------
# Pass 1: add -> LN1 -> Q/K/V projections (row-parallel, runs once per row)
# --------------------------------------------------------------------------
def _make_proj_kernel(add_residual: bool):
    def kernel(*refs):
        if add_residual:
            hs_ref, res_ref = refs[0], refs[1]
            (ln1w, ln1b, wq, bq, wk, bk, wv, bv) = refs[2:10]
            q_ref, k_ref, v_ref, resid_ref = refs[10:14]
        else:
            hs_ref, res_ref = refs[0], None
            (ln1w, ln1b, wq, bq, wk, bk, wv, bv) = refs[1:9]
            q_ref, k_ref, v_ref, resid_ref = refs[9:13]

        x = hs_ref[0]                                    # (TL, D) fp32
        if add_residual:
            x = x + res_ref[0]
        resid_ref[0] = x                                 # fp32 residual stream

        h = _layernorm(x, ln1w[...], ln1b[...]).astype(jnp.bfloat16)

        # 1/sqrt(D) is pre-folded into wq / bq in the wrapper.
        q_ref[0] = (jnp.dot(h, wq[...], preferred_element_type=jnp.float32)
                    + bq[...]).astype(jnp.bfloat16)
        k_ref[0] = (jnp.dot(h, wk[...], preferred_element_type=jnp.float32)
                    + bk[...]).astype(jnp.bfloat16)
        v_ref[0] = (jnp.dot(h, wv[...], preferred_element_type=jnp.float32)
                    + bv[...]).astype(jnp.bfloat16)

    return kernel


# --------------------------------------------------------------------------
# Pass 2: flash-style attention over K/V tiles + Wo + residual add + LN2
# --------------------------------------------------------------------------
def _make_attn_kernel(l_actual: int, tk: int, mask_tail: bool):
    def kernel(q_ref, k_ref, v_ref, resid_ref, wo_ref, bo_ref, ln2w_ref, ln2b_ref,
               mix_ref, res_out_ref, m_sc, l_sc, acc_sc):
        ki = pl.program_id(2)

        @pl.when(ki == 0)
        def _():
            m_sc[...] = jnp.full_like(m_sc, NEG_INF)
            l_sc[...] = jnp.zeros_like(l_sc)
            acc_sc[...] = jnp.zeros_like(acc_sc)

        # scores = q @ k^T via a transposed contraction (no materialized k.T);
        # the 1/sqrt(D) scale is already folded into q.
        s = lax.dot_general(q_ref[0], k_ref[0], (((1,), (1,)), ((), ())),
                            preferred_element_type=jnp.float32)        # (TL, TK)
        if mask_tail:
            col = ki * tk + lax.broadcasted_iota(jnp.int32, s.shape, 1)
            s = jnp.where(col < l_actual, s, NEG_INF)

        m_prev = m_sc[...]
        m_new = jnp.maximum(m_prev, jnp.max(s, axis=-1, keepdims=True))
        alpha = jnp.exp(m_prev - m_new)
        p = jnp.exp(s - m_new)
        l_sc[...] = alpha * l_sc[...] + jnp.sum(p, axis=-1, keepdims=True)
        acc_sc[...] = alpha * acc_sc[...] + jnp.dot(
            p.astype(jnp.bfloat16), v_ref[0], preferred_element_type=jnp.float32)
        m_sc[...] = m_new

        @pl.when(ki == pl.num_programs(2) - 1)
        def _():
            attn = acc_sc[...] * pl.reciprocal(l_sc[...], approx=True)
            mix = jnp.dot(attn.astype(jnp.bfloat16), wo_ref[...],
                          preferred_element_type=jnp.float32) + bo_ref[...]
            mix_ref[0] = mix.astype(jnp.bfloat16)        # MLP input (MXU operand)
            resid2 = mix + resid_ref[0]                  # fp32 residual stream
            res_out_ref[0] = _layernorm(resid2, ln2w_ref[...], ln2b_ref[...])

    return kernel


# --------------------------------------------------------------------------
# Pass 3: GELU MLP, hidden dim streamed in TH-chunks with fp32 accumulation
# --------------------------------------------------------------------------
def _mlp_kernel(mix_ref, w1_ref, b1_ref, w2_ref, b2_ref, hs_out_ref, acc_sc):
    hi = pl.program_id(2)

    @pl.when(hi == 0)
    def _():
        acc_sc[...] = jnp.zeros_like(acc_sc)

    hmid = jnp.dot(mix_ref[0], w1_ref[...],
                   preferred_element_type=jnp.float32) + b1_ref[...]
    # TODO(synk): PyTorch nn.GELU defaults to exact erf; tanh approx used here.
    hmid = jax.nn.gelu(hmid, approximate=True)
    acc_sc[...] += jnp.dot(hmid.astype(jnp.bfloat16), w2_ref[...],
                           preferred_element_type=jnp.float32)

    @pl.when(hi == pl.num_programs(2) - 1)
    def _():
        hs_out_ref[0] = acc_sc[...] + b2_ref[...]


# --------------------------------------------------------------------------
# Wrapper
# --------------------------------------------------------------------------
def block_forward(hidden_states, residual, params, *, tl=None, th=None):
    """hidden_states: (B, L, D) fp32; residual: (B, L, D) fp32 or None."""
    B, L, D = hidden_states.shape
    H = params["w1"].shape[1]
    add_residual = residual is not None

    # ---- tiling: pad L up to a multiple of an MXU-shaped row tile ----
    if tl is None:
        # TODO(synk): a multiple of 128 suffices on v5e (4x 128x128 MXUs).
        tl = min(256, _round_up(L, 8))
    L_pad = _round_up(L, tl)
    nr = L_pad // tl
    tk = tl                              # K/V tile for the online softmax
    nk = L_pad // tk
    if th is None:
        th = H
        if H > 2048:                     # bound resident MLP weights (v7x VMEM)
            for c in range(2048, 127, -128):
                if H % c == 0:
                    th = c
                    break
    nh = H // th

    if L_pad != L:
        pad = ((0, 0), (0, L_pad - L), (0, 0))
        hidden_states = jnp.pad(hidden_states, pad)
        if add_residual:
            residual = jnp.pad(residual, pad)

    f32 = jnp.float32
    bf = lambda w: w.astype(jnp.bfloat16)
    inv_sqrt_d = 1.0 / math.sqrt(D)

    # ---------------- Pass 1: add + LN1 + Q/K/V ----------------
    ln1w, ln1b = params["ln1_w"], params["ln1_b"]
    wq = bf(params["wq"] * inv_sqrt_d)          # fold 1/sqrt(D) into Wq / bq
    bq = params["bq"] * inv_sqrt_d
    wk, bk = bf(params["wk"]), params["bk"]
    wv, bv = bf(params["wv"]), params["bv"]

    row2 = pl.BlockSpec((1, tl, D), lambda b, r: (b, r, 0))
    p1_params = [ln1w, ln1b, wq, bq, wk, bk, wv, bv]
    p1_param_specs = [_invariant_spec(p.shape, lambda *_: (0, 0)) for p in p1_params]

    p1_inputs = [hidden_states] + ([residual] if add_residual else []) + p1_params
    p1_specs = [row2] + ([row2] if add_residual else []) + p1_param_specs

    q, k, v, resid = pl.pallas_call(
        _make_proj_kernel(add_residual),
        grid=(B, nr),
        in_specs=p1_specs,
        out_specs=(row2, row2, row2, row2),
        out_shape=(
            jax.ShapeDtypeStruct((B, L_pad, D), jnp.bfloat16),   # q
            jax.ShapeDtypeStruct((B, L_pad, D), jnp.bfloat16),   # k
            jax.ShapeDtypeStruct((B, L_pad, D), jnp.bfloat16),   # v
            jax.ShapeDtypeStruct((B, L_pad, D), f32),            # residual (fp32)
        ),
        compiler_params=pltpu.CompilerParams(
            dimension_semantics=("parallel", "parallel"),
            vmem_limit_bytes=_VMEM_LIMIT),
    )(*p1_inputs)

    # ---------------- Pass 2: online-softmax attention + Wo + LN2 ----------------
    wo, bo = bf(params["wo"]), params["bo"]
    ln2w, ln2b = params["ln2_w"], params["ln2_b"]

    q_spec = pl.BlockSpec((1, tl, D), lambda b, qi, ki: (b, qi, 0))
    kv_spec = pl.BlockSpec((1, tk, D), lambda b, qi, ki: (b, ki, 0))
    p2_params = [wo, bo, ln2w, ln2b]
    p2_param_specs = [_invariant_spec(p.shape, lambda *_: (0, 0)) for p in p2_params]

    mix, res_out = pl.pallas_call(
        _make_attn_kernel(L, tk, L_pad != L),
        grid=(B, nr, nk),
        in_specs=[q_spec, kv_spec, kv_spec, q_spec] + p2_param_specs,
        out_specs=(q_spec, q_spec),
        out_shape=(
            jax.ShapeDtypeStruct((B, L_pad, D), jnp.bfloat16),   # mixer out (MLP in)
            jax.ShapeDtypeStruct((B, L_pad, D), f32),            # normed residual
        ),
        scratch_shapes=[
            pltpu.VMEM((tl, 1), f32),    # running max
            pltpu.VMEM((tl, 1), f32),    # running denominator
            pltpu.VMEM((tl, D), f32),    # output accumulator
        ],
        compiler_params=pltpu.CompilerParams(
            dimension_semantics=("parallel", "parallel", "arbitrary"),
            vmem_limit_bytes=_VMEM_LIMIT),
    )(q, k, v, resid, *p2_params)

    # ---------------- Pass 3: MLP (H streamed in TH chunks) ----------------
    w1, b1 = bf(params["w1"]), params["b1"]
    w2, b2 = bf(params["w2"]), params["b2"]

    row3 = pl.BlockSpec((1, tl, D), lambda b, r, h: (b, r, 0))
    w1_spec = pl.BlockSpec((D, th), lambda b, r, h: (0, h))
    b1_spec = pl.BlockSpec((1, th), lambda b, r, h: (0, h))
    w2_spec = pl.BlockSpec((th, D), lambda b, r, h: (h, 0))
    b2_spec = _invariant_spec(b2.shape, lambda *_: (0, 0))

    hs_out = pl.pallas_call(
        _mlp_kernel,
        grid=(B, nr, nh),
        in_specs=[row3, w1_spec, b1_spec, w2_spec, b2_spec],
        out_specs=row3,
        out_shape=jax.ShapeDtypeStruct((B, L_pad, D), f32),
        scratch_shapes=[pltpu.VMEM((tl, D), f32)],
        compiler_params=pltpu.CompilerParams(
            dimension_semantics=("parallel", "parallel", "arbitrary"),
            vmem_limit_bytes=_VMEM_LIMIT),
    )(mix, w1, b1, w2, b2)

    if L_pad != L:
        hs_out = hs_out[:, :L, :]
        res_out = res_out[:, :L, :]
    return hs_out, res_out


# --------------------------------------------------------------------------
# Pure-JAX fp32 reference mirroring the PyTorch forward
# --------------------------------------------------------------------------
def _reference(hidden_states, residual, params):
    def ln(x, w, b):
        m = jnp.mean(x, -1, keepdims=True)
        v = jnp.mean((x - m) ** 2, -1, keepdims=True)
        return (x - m) / jnp.sqrt(v + EPS) * w + b

    resid = hidden_states if residual is None else hidden_states + residual
    h = ln(resid, params["ln1_w"], params["ln1_b"])
    d = h.shape[-1]
    q = h @ params["wq"] + params["bq"]
    k = h @ params["wk"] + params["bk"]
    v = h @ params["wv"] + params["bv"]
    s = jnp.einsum("bld,bmd->blm", q, k) / math.sqrt(d)
    p = jax.nn.softmax(s, axis=-1)
    a = jnp.einsum("blm,bmd->bld", p, v)
    mix = a @ params["wo"] + params["bo"]
    resid2 = mix + resid
    resid2n = ln(resid2, params["ln2_w"], params["ln2_b"])
    hmid = jax.nn.gelu(mix @ params["w1"] + params["b1"], approximate=True)
    out = hmid @ params["w2"] + params["b2"]
    return out, resid2n


def make_params(key, D, H):
    ks = jax.random.split(key, 8)
    scale_d = 1.0 / math.sqrt(D)
    scale_h = 1.0 / math.sqrt(H)
    return {
        "ln1_w": jnp.ones((1, D), jnp.float32),
        "ln1_b": jnp.zeros((1, D), jnp.float32),
        "ln2_w": jnp.ones((1, D), jnp.float32),
        "ln2_b": jnp.zeros((1, D), jnp.float32),
        "wq": jax.random.normal(ks[0], (D, D), jnp.float32) * scale_d,
        "bq": jnp.zeros((1, D), jnp.float32),
        "wk": jax.random.normal(ks[1], (D, D), jnp.float32) * scale_d,
        "bk": jnp.zeros((1, D), jnp.float32),
        "wv": jax.random.normal(ks[2], (D, D), jnp.float32) * scale_d,
        "bv": jnp.zeros((1, D), jnp.float32),
        "wo": jax.random.normal(ks[3], (D, D), jnp.float32) * scale_d,
        "bo": jnp.zeros((1, D), jnp.float32),
        "w1": jax.random.normal(ks[4], (D, H), jnp.float32) * scale_d,
        "b1": jnp.zeros((1, H), jnp.float32),
        "w2": jax.random.normal(ks[5], (H, D), jnp.float32) * scale_h,
        "b2": jnp.zeros((1, D), jnp.float32),
    }


if __name__ == "__main__":
    B, L, D = 2, 8, 32     # batch, seq, hidden
    H = 4 * D              # MLP hidden

    key = jax.random.PRNGKey(0)
    k_x, k_r, k_p = jax.random.split(key, 3)
    hidden_states = jax.random.normal(k_x, (B, L, D), jnp.float32)
    residual = jax.random.normal(k_r, (B, L, D), jnp.float32)
    params = make_params(k_p, D, H)

    # bf16 MXU inputs + approx reciprocal -> compare against the fp32 reference
    # with a bf16-appropriate tolerance.
    TOL = dict(rtol=1e-1, atol=1e-1)

    # Path 1: generic block (with residual)
    hs_out, res_out = block_forward(hidden_states, residual, params)
    jax.block_until_ready((hs_out, res_out))
    hs_want, res_want = _reference(hidden_states, residual, params)
    np.testing.assert_allclose(np.asarray(hs_out), np.asarray(hs_want), **TOL)
    np.testing.assert_allclose(np.asarray(res_out), np.asarray(res_want), **TOL)

    # Path 2: first block (residual=None) — the add is statically skipped
    hs_out0, res_out0 = block_forward(hidden_states, None, params)
    jax.block_until_ready((hs_out0, res_out0))
    hs_want0, res_want0 = _reference(hidden_states, None, params)
    np.testing.assert_allclose(np.asarray(hs_out0), np.asarray(hs_want0), **TOL)
    np.testing.assert_allclose(np.asarray(res_out0), np.asarray(res_want0), **TOL)

    # Path 3: non-tile-multiple L with explicit small tiles — exercises padding,
    # the softmax tail mask and the multi-tile online-softmax loop.
    Lr = 40
    hs_r = jax.random.normal(jax.random.PRNGKey(1), (B, Lr, D), jnp.float32)
    rs_r = jax.random.normal(jax.random.PRNGKey(2), (B, Lr, D), jnp.float32)
    hs_out_r, res_out_r = block_forward(hs_r, rs_r, params, tl=16)
    jax.block_until_ready((hs_out_r, res_out_r))
    hs_want_r, res_want_r = _reference(hs_r, rs_r, params)
    np.testing.assert_allclose(np.asarray(hs_out_r), np.asarray(hs_want_r), **TOL)
    np.testing.assert_allclose(np.asarray(res_out_r), np.asarray(res_want_r), **TOL)

    print("KERNEL_OK")
</pallas_src>

<mosaic_0001>
module attributes {stable_mosaic.version = 11 : i64} {
  func.func @kernel(%arg0: i32, %arg1: i32, %arg2: memref<1x8x32xf32, #tpu.memory_space<vmem>>, %arg3: memref<1x8x32xf32, #tpu.memory_space<vmem>>, %arg4: memref<1x32xf32, #tpu.memory_space<vmem>>, %arg5: memref<1x32xf32, #tpu.memory_space<vmem>>, %arg6: memref<32x32xbf16, #tpu.memory_space<vmem>>, %arg7: memref<1x32xf32, #tpu.memory_space<vmem>>, %arg8: memref<32x32xbf16, #tpu.memory_space<vmem>>, %arg9: memref<1x32xf32, #tpu.memory_space<vmem>>, %arg10: memref<32x32xbf16, #tpu.memory_space<vmem>>, %arg11: memref<1x32xf32, #tpu.memory_space<vmem>>, %arg12: memref<1x8x32xbf16, #tpu.memory_space<vmem>>, %arg13: memref<1x8x32xbf16, #tpu.memory_space<vmem>>, %arg14: memref<1x8x32xbf16, #tpu.memory_space<vmem>>, %arg15: memref<1x8x32xf32, #tpu.memory_space<vmem>>) attributes {dimension_semantics = [#tpu.dimension_semantics<parallel>, #tpu.dimension_semantics<parallel>], iteration_bounds = array<i64: 2, 1>, scalar_prefetch = 0 : i64, scratch_operands = 0 : i64, tpu.core_type = #tpu.core_type<tc>, window_params = [{transform_indices = @transform_0, window_bounds = array<i64: 1, 8, 32>}, {transform_indices = @transform_1, window_bounds = array<i64: 1, 8, 32>}, {pipeline_mode = #tpu.pipeline_mode<synchronous>, transform_indices = @transform_2, window_bounds = array<i64: 1, 32>}, {pipeline_mode = #tpu.pipeline_mode<synchronous>, transform_indices = @transform_3, window_bounds = array<i64: 1, 32>}, {pipeline_mode = #tpu.pipeline_mode<synchronous>, transform_indices = @transform_4, window_bounds = array<i64: 32, 32>}, {pipeline_mode = #tpu.pipeline_mode<synchronous>, transform_indices = @transform_5, window_bounds = array<i64: 1, 32>}, {pipeline_mode = #tpu.pipeline_mode<synchronous>, transform_indices = @transform_6, window_bounds = array<i64: 32, 32>}, {pipeline_mode = #tpu.pipeline_mode<synchronous>, transform_indices = @transform_7, window_bounds = array<i64: 1, 32>}, {pipeline_mode = #tpu.pipeline_mode<synchronous>, transform_indices = @transform_8, window_bounds = array<i64: 32, 32>}, {pipeline_mode = #tpu.pipeline_mode<synchronous>, transform_indices = @transform_9, window_bounds = array<i64: 1, 32>}, {transform_indices = @transform_10, window_bounds = array<i64: 1, 8, 32>}, {transform_indices = @transform_11, window_bounds = array<i64: 1, 8, 32>}, {transform_indices = @transform_12, window_bounds = array<i64: 1, 8, 32>}, {transform_indices = @transform_13, window_bounds = array<i64: 1, 8, 32>}]} {
    %c0 = arith.constant 0 : index
    %c0_0 = arith.constant 0 : index
    %c0_1 = arith.constant 0 : index
    %0 = vector.load %arg2[%c0, %c0_0, %c0_1] : memref<1x8x32xf32, #tpu.memory_space<vmem>>, vector<1x8x32xf32>
    %1 = vector.shape_cast %0 : vector<1x8x32xf32> to vector<8x32xf32>
    %c0_2 = arith.constant 0 : index
    %c0_3 = arith.constant 0 : index
    %c0_4 = arith.constant 0 : index
    %2 = vector.load %arg3[%c0_2, %c0_3, %c0_4] : memref<1x8x32xf32, #tpu.memory_space<vmem>>, vector<1x8x32xf32>
    %3 = vector.shape_cast %2 : vector<1x8x32xf32> to vector<8x32xf32>
    %4 = arith.addf %1, %3 : vector<8x32xf32>
    %c0_5 = arith.constant 0 : index
    %c0_6 = arith.constant 0 : index
    %c0_7 = arith.constant 0 : index
    %5 = vector.load %arg15[%c0_5, %c0_6, %c0_7] : memref<1x8x32xf32, #tpu.memory_space<vmem>>, vector<1x8x32xf32>
    %6 = vector.shape_cast %5 : vector<1x8x32xf32> to vector<8x32xf32>
    %7 = vector.shape_cast %4 : vector<8x32xf32> to vector<1x8x32xf32>
    tpu.vector_store %arg15[%c0_5, %c0_6, %c0_7], %7 {strides = array<i32>} : memref<1x8x32xf32, #tpu.memory_space<vmem>>, vector<1x8x32xf32>,
    %c0_8 = arith.constant 0 : index
    %c0_9 = arith.constant 0 : index
    %8 = vector.load %arg4[%c0_8, %c0_9] : memref<1x32xf32, #tpu.memory_space<vmem>>, vector<1x32xf32>
    %c0_10 = arith.constant 0 : index
    %c0_11 = arith.constant 0 : index
    %9 = vector.load %arg5[%c0_10, %c0_11] : memref<1x32xf32, #tpu.memory_space<vmem>>, vector<1x32xf32>
    %cst = arith.constant dense<0.000000e+00> : vector<8xf32>
    %10 = vector.multi_reduction <add>, %4, %cst [1] : vector<8x32xf32> to vector<8xf32>
    %11 = vector.shape_cast %10 : vector<8xf32> to vector<8x1xf32>
    %cst_12 = arith.constant 3.200000e+01 : f32
    %12 = vector.broadcast %cst_12 : f32 to vector<8x1xf32>
    %13 = arith.divf %11, %12 : vector<8x1xf32>
    %14 = vector.broadcast %13 : vector<8x1xf32> to vector<8x32xf32>
    %15 = arith.subf %4, %14 : vector<8x32xf32>
    %16 = arith.mulf %15, %15 : vector<8x32xf32>
    %cst_13 = arith.constant dense<0.000000e+00> : vector<8xf32>
    %17 = vector.multi_reduction <add>, %16, %cst_13 [1] : vector<8x32xf32> to vector<8xf32>
    %18 = vector.shape_cast %17 : vector<8xf32> to vector<8x1xf32>
    %cst_14 = arith.constant 3.200000e+01 : f32
    %19 = vector.broadcast %cst_14 : f32 to vector<8x1xf32>
    %20 = arith.divf %18, %19 : vector<8x1xf32>
    %cst_15 = arith.constant 9.99999974E-6 : f32
    %21 = vector.broadcast %cst_15 : f32 to vector<8x1xf32>
    %22 = arith.addf %20, %21 : vector<8x1xf32>
    %23 = math.rsqrt %22 : vector<8x1xf32>
    %24 = vector.broadcast %23 : vector<8x1xf32> to vector<8x32xf32>
    %25 = arith.mulf %15, %24 : vector<8x32xf32>
    %26 = vector.broadcast %8 : vector<1x32xf32> to vector<8x32xf32>
    %27 = arith.mulf %25, %26 : vector<8x32xf32>
    %28 = vector.broadcast %9 : vector<1x32xf32> to vector<8x32xf32>
    %29 = arith.addf %27, %28 : vector<8x32xf32>
    %30 = arith.truncf %29 : vector<8x32xf32> to vector<8x32xbf16>
    %c0_16 = arith.constant 0 : index
    %c0_17 = arith.constant 0 : index
    %31 = vector.load %arg6[%c0_16, %c0_17] : memref<32x32xbf16, #tpu.memory_space<vmem>>, vector<32x32xbf16>
    %cst_18 = arith.constant dense<0.000000e+00> : vector<8x32xf32>
    %32 = tpu.matmul %30, %31, %cst_18 {dimension_numbers = #tpu.dot_dimension_numbers<[1], [0], [0], [1], [0, 0, 1, 1], [], []>} : vector<8x32xbf16>, vector<32x32xbf16>, vector<8x32xf32> -> vector<8x32xf32>
    %c0_19 = arith.constant 0 : index
    %c0_20 = arith.constant 0 : index
    %33 = vector.load %arg7[%c0_19, %c0_20] : memref<1x32xf32, #tpu.memory_space<vmem>>, vector<1x32xf32>
    %34 = vector.broadcast %33 : vector<1x32xf32> to vector<8x32xf32>
    %35 = arith.addf %32, %34 : vector<8x32xf32>
    %36 = arith.truncf %35 : vector<8x32xf32> to vector<8x32xbf16>
    %c0_21 = arith.constant 0 : index
    %c0_22 = arith.constant 0 : index
    %c0_23 = arith.constant 0 : index
    %37 = vector.load %arg12[%c0_21, %c0_22, %c0_23] : memref<1x8x32xbf16, #tpu.memory_space<vmem>>, vector<1x8x32xbf16>
    %38 = vector.shape_cast %37 : vector<1x8x32xbf16> to vector<8x32xbf16>
    %39 = vector.shape_cast %36 : vector<8x32xbf16> to vector<1x8x32xbf16>
    tpu.vector_store %arg12[%c0_21, %c0_22, %c0_23], %39 {strides = array<i32>} : memref<1x8x32xbf16, #tpu.memory_space<vmem>>, vector<1x8x32xbf16>,
    %c0_24 = arith.constant 0 : index
    %c0_25 = arith.constant 0 : index
    %40 = vector.load %arg8[%c0_24, %c0_25] : memref<32x32xbf16, #tpu.memory_space<vmem>>, vector<32x32xbf16>
    %cst_26 = arith.constant dense<0.000000e+00> : vector<8x32xf32>
    %41 = tpu.matmul %30, %40, %cst_26 {dimension_numbers = #tpu.dot_dimension_numbers<[1], [0], [0], [1], [0, 0, 1, 1], [], []>} : vector<8x32xbf16>, vector<32x32xbf16>, vector<8x32xf32> -> vector<8x32xf32>
    %c0_27 = arith.constant 0 : index
    %c0_28 = arith.constant 0 : index
    %42 = vector.load %arg9[%c0_27, %c0_28] : memref<1x32xf32, #tpu.memory_space<vmem>>, vector<1x32xf32>
    %43 = vector.broadcast %42 : vector<1x32xf32> to vector<8x32xf32>
    %44 = arith.addf %41, %43 : vector<8x32xf32>
    %45 = arith.truncf %44 : vector<8x32xf32> to vector<8x32xbf16>
    %c0_29 = arith.constant 0 : index
    %c0_30 = arith.constant 0 : index
    %c0_31 = arith.constant 0 : index
    %46 = vector.load %arg13[%c0_29, %c0_30, %c0_31] : memref<1x8x32xbf16, #tpu.memory_space<vmem>>, vector<1x8x32xbf16>
    %47 = vector.shape_cast %46 : vector<1x8x32xbf16> to vector<8x32xbf16>
    %48 = vector.shape_cast %45 : vector<8x32xbf16> to vector<1x8x32xbf16>
    tpu.vector_store %arg13[%c0_29, %c0_30, %c0_31], %48 {strides = array<i32>} : memref<1x8x32xbf16, #tpu.memory_space<vmem>>, vector<1x8x32xbf16>,
    %c0_32 = arith.constant 0 : index
    %c0_33 = arith.constant 0 : index
    %49 = vector.load %arg10[%c0_32, %c0_33] : memref<32x32xbf16, #tpu.memory_space<vmem>>, vector<32x32xbf16>
    %cst_34 = arith.constant dense<0.000000e+00> : vector<8x32xf32>
    %50 = tpu.matmul %30, %49, %cst_34 {dimension_numbers = #tpu.dot_dimension_numbers<[1], [0], [0], [1], [0, 0, 1, 1], [], []>} : vector<8x32xbf16>, vector<32x32xbf16>, vector<8x32xf32> -> vector<8x32xf32>
    %c0_35 = arith.constant 0 : index
    %c0_36 = arith.constant 0 : index
    %51 = vector.load %arg11[%c0_35, %c0_36] : memref<1x32xf32, #tpu.memory_space<vmem>>, vector<1x32xf32>
    %52 = vector.broadcast %51 : vector<1x32xf32> to vector<8x32xf32>
    %53 = arith.addf %50, %52 : vector<8x32xf32>
    %54 = arith.truncf %53 : vector<8x32xf32> to vector<8x32xbf16>
    %c0_37 = arith.constant 0 : index
    %c0_38 = arith.constant 0 : index
    %c0_39 = arith.constant 0 : index
    %55 = vector.load %arg14[%c0_37, %c0_38, %c0_39] : memref<1x8x32xbf16, #tpu.memory_space<vmem>>, vector<1x8x32xbf16>
    %56 = vector.shape_cast %55 : vector<1x8x32xbf16> to vector<8x32xbf16>
    %57 = vector.shape_cast %54 : vector<8x32xbf16> to vector<1x8x32xbf16>
    tpu.vector_store %arg14[%c0_37, %c0_38, %c0_39], %57 {strides = array<i32>} : memref<1x8x32xbf16, #tpu.memory_space<vmem>>, vector<1x8x32xbf16>,
    return
  }
  func.func @transform_0(%arg0: i32, %arg1: i32) -> (i32, i32, i32) {
    %c0_i32 = arith.constant 0 : i32
    %c0_i32_0 = arith.constant 0 : i32
    return %arg0, %arg1, %c0_i32 : i32, i32, i32
  }
  func.func @transform_1(%arg0: i32, %arg1: i32) -> (i32, i32, i32) {
    %c0_i32 = arith.constant 0 : i32
    %c0_i32_0 = arith.constant 0 : i32
    return %arg0, %arg1, %c0_i32 : i32, i32, i32
  }
  func.func @transform_2(%arg0: i32, %arg1: i32) -> (i32, i32) {
    %c0_i32 = arith.constant 0 : i32
    %c0_i32_0 = arith.constant 0 : i32
    %c0_i32_1 = arith.constant 0 : i32
    return %c0_i32, %c0_i32_0 : i32, i32
  }
  func.func @transform_3(%arg0: i32, %arg1: i32) -> (i32, i32) {
    %c0_i32 = arith.constant 0 : i32
    %c0_i32_0 = arith.constant 0 : i32
    %c0_i32_1 = arith.constant 0 : i32
    return %c0_i32, %c0_i32_0 : i32, i32
  }
  func.func @transform_4(%arg0: i32, %arg1: i32) -> (i32, i32) {
    %c0_i32 = arith.constant 0 : i32
    %c0_i32_0 = arith.constant 0 : i32
    %c0_i32_1 = arith.constant 0 : i32
    return %c0_i32, %c0_i32_0 : i32, i32
  }
  func.func @transform_5(%arg0: i32, %arg1: i32) -> (i32, i32) {
    %c0_i32 = arith.constant 0 : i32
    %c0_i32_0 = arith.constant 0 : i32
    %c0_i32_1 = arith.constant 0 : i32
    return %c0_i32, %c0_i32_0 : i32, i32
  }
  func.func @transform_6(%arg0: i32, %arg1: i32) -> (i32, i32) {
    %c0_i32 = arith.constant 0 : i32
    %c0_i32_0 = arith.constant 0 : i32
    %c0_i32_1 = arith.constant 0 : i32
    return %c0_i32, %c0_i32_0 : i32, i32
  }
  func.func @transform_7(%arg0: i32, %arg1: i32) -> (i32, i32) {
    %c0_i32 = arith.constant 0 : i32
    %c0_i32_0 = arith.constant 0 : i32
    %c0_i32_1 = arith.constant 0 : i32
    return %c0_i32, %c0_i32_0 : i32, i32
  }
  func.func @transform_8(%arg0: i32, %arg1: i32) -> (i32, i32) {
    %c0_i32 = arith.constant 0 : i32
    %c0_i32_0 = arith.constant 0 : i32
    %c0_i32_1 = arith.constant 0 : i32
    return %c0_i32, %c0_i32_0 : i32, i32
  }
  func.func @transform_9(%arg0: i32, %arg1: i32) -> (i32, i32) {
    %c0_i32 = arith.constant 0 : i32
    %c0_i32_0 = arith.constant 0 : i32
    %c0_i32_1 = arith.constant 0 : i32
    return %c0_i32, %c0_i32_0 : i32, i32
  }
  func.func @transform_10(%arg0: i32, %arg1: i32) -> (i32, i32, i32) {
    %c0_i32 = arith.constant 0 : i32
    %c0_i32_0 = arith.constant 0 : i32
    return %arg0, %arg1, %c0_i32 : i32, i32, i32
  }
  func.func @transform_11(%arg0: i32, %arg1: i32) -> (i32, i32, i32) {
    %c0_i32 = arith.constant 0 : i32
    %c0_i32_0 = arith.constant 0 : i32
    return %arg0, %arg1, %c0_i32 : i32, i32, i32
  }
  func.func @transform_12(%arg0: i32, %arg1: i32) -> (i32, i32, i32) {
    %c0_i32 = arith.constant 0 : i32
    %c0_i32_0 = arith.constant 0 : i32
    return %arg0, %arg1, %c0_i32 : i32, i32, i32
  }
  func.func @transform_13(%arg0: i32, %arg1: i32) -> (i32, i32, i32) {
    %c0_i32 = arith.constant 0 : i32
    %c0_i32_0 = arith.constant 0 : i32
    return %arg0, %arg1, %c0_i32 : i32, i32, i32
  }
}

</mosaic_0001>

<bundles_post_ra>
// kernel: tpu_custom_call.1
= control target key start
LH: loop header
LB: loop body
LE: loop exit
PB: predicated region body
PF: predicated region fallthrough
CT: control target
= control target key end

     0   :  { %s2099_s0 = inlined_call_operand.hbm [shape: f32[2,8,32], index: 0, kind: input, shape index: {}]   ;;  %s2100_s1 = inlined_call_operand.hbm [shape: f32[2,8,32], index: 1, kind: input, shape index: {}]   ;;  %s2101_s2 = inlined_call_operand.vmem [shape: f32[1,32], index: 2, kind: input, shape index: {}]   ;;  %s2102_s3 = inlined_call_operand.vmem [shape: f32[1,32], index: 3, kind: input, shape index: {}]   ;;  %s2103_s4 = inlined_call_operand.hbm [shape: bf16[32,32], index: 4, kind: input, shape index: {}]   ;;  %s2104_s5 = inlined_call_operand.vmem [shape: f32[1,32], index: 5, kind: input, shape index: {}]   ;;  %s2105_s6 = inlined_call_operand.vmem [shape: bf16[32,32], index: 6, kind: input, shape index: {}]   ;;  %s2106_s7 = inlined_call_operand.vmem [shape: f32[1,32], index: 7, kind: input, shape index: {}]   ;;  %s2107_s8 = inlined_call_operand.hbm [shape: bf16[32,32], index: 8, kind: input, shape index: {}]   ;;  %s2108_s9 = inlined_call_operand.vmem [shape: f32[1,32], index: 9, kind: input, shape index: {}]   ;;  %s2109_s10 = inlined_call_operand.hbm [shape: bf16[2,8,32], index: 10, kind: output, shape index: {0}]   ;;  %s2110_s11 = inlined_call_operand.hbm [shape: bf16[2,8,32], index: 11, kind: output, shape index: {1}]   ;;  %s2111_s12 = inlined_call_operand.hbm [shape: bf16[2,8,32], index: 12, kind: output, shape index: {2}]   ;;  %s2112_s13 = inlined_call_operand.hbm [shape: f32[2,8,32], index: 13, kind: output, shape index: {3}]  }
   0x1   :  { %2125 = sst [smem:[#allocation28_spill]] %s2099_s0 }
   0x2   :  { %2126 = sst [smem:[#allocation29_spill]] %s2103_s4 }
   0x3   :  { %2127 = sst [smem:[#allocation30_spill]] %s2106_s7 }
   0x4   :  { %2128 = sst [smem:[#allocation31_spill]] %s2107_s8 }
   0x5   :  { %2129 = sst [smem:[#allocation32_spill]] %s2108_s9 }
   0x6   :  { %2130 = sst [smem:[#allocation33_spill]] %s2109_s10 }
   0x7   :  { %2131 = sst [smem:[#allocation34_spill]] %s2110_s11 }
   0x8   :  { %2132 = sst [smem:[#allocation35_spill]] %s2111_s12 }
   0x9   :  { %19 = vsyncpa [#allocation3], 0 }
   0xa   :  { %21 = vsyncpa [#allocation3 + $0x1], 0 }
   0xb   :  { %22 = vsyncpa [#allocation6], 0 }
   0xc   :  { %24 = vsyncpa [#allocation6 + $0x1], 0 }
   0xd   :  { %25 = vsyncpa [#allocation9], 0 }
   0xe   :  { %26 = vsyncpa [#allocation4], 0 }
   0xf   :  { %28 = vsyncpa [#allocation4 + $0x1], 0 }
  0x10   :  { %29 = vsyncpa [#allocation12], 0 }
  0x11   :  { %31 = vsyncpa [#allocation12 + $0x1], 0 }
  0x12   :  { %32 = vsyncpa [#allocation15], 0 }
  0x13   :  { %34 = vsyncpa [#allocation15 + $0x1], 0  ;;  %s1680_s25 = smov 0   ;;  %s1682_s26 = smov 0  }
  0x14   :  { %s1684_s27 = smov 0   ;;  %s1686_s28 = smov 0  }
  0x15   :  { %s1688_s29 = smov 0   ;;  %s1690_s30 = smov 0  }
  0x16 LB: > { %2133 = sst [smem:[#allocation23_spill]] %s1576_s25  ;;  %s1711_s14 = sadd.s32 4294967295, %s1596_s30   ;;  %s1596_s30 = sphi %s1690_s30, %s40_s30   ;;  %s1592_s29 = sphi %s1688_s29, %s2168_s29   ;;  %s1588_s28 = sphi %s1686_s28, %s2167_s28   ;;  %s1584_s27 = sphi %s1684_s27, %s2171_s27   ;;  %s1580_s26 = sphi %s1682_s26, %s2170_s26   ;;  %s1576_s25 = sphi %s1680_s25, %s2169_s25  }
  0x17   : > { %2134 = sst [smem:[#allocation24_spill]] %s1592_s29  ;;  %s2113_s15 = sadd.s32 4294967294, %s1596_s30  }
  0x18   : > { %p74_p0 = scmp.ne.s32.totalorder %s1580_s26, %s1576_s25  ;;  %p2117_p1 = scmp.eq.s32.totalorder %s1711_s14, 0 }
  0x19   : > { %p302_p3 = scmp.eq.s32.totalorder %s2113_s15, 1  ;;  %p1105_p5 = scmp.ge.s32.totalorder %s1596_s30, 1 }
  0x1a   : > { %p1722_p4 = por %p2117_p1, %p74_p0  ;;  %p393_p7 = scmp.lt.s32.totalorder %s1596_s30, 3 }
  0x1b   : > { %p1727_p6 = por %p302_p3, %p74_p0  ;;  %s1598_s19 = smov [#allocation7]  }
  0x1c   : > { %s2135_s16 = scalar_select %p1722_p4, 1, 0 }
  0x1d   : > { %s2136_s17 = scalar_select %p1727_p6, 1, 0 }
  0x1e   : > { %p1732_p8 = pnand %p1105_p5, %p393_p7  ;;  %s411_s20 = sshll.u32 %s1598_s19, 4  ;;  %s1736_s20 = int_to_ptr.vmem [resolvable:$true] %s411_s20 }
  0x1f   : > { %2137 = sst [smem:[#allocation25_spill]] %s2136_s17  ;;  %s1599_s22 = smov [#allocation8]  }
  0x20   : > { %s2138_s18 = scalar_select %p1732_p8, 1, 0 }
  0x21   : > { %p1199_p9 = pneg %p1732_p8  ;;  %s433_s23 = sshll.u32 %s1599_s22, 4  ;;  %s1747_s23 = int_to_ptr.vmem [resolvable:$true] %s433_s23 }
  0x22   : > { %s2140_s4 = sld [smem:[#allocation29_spill]] }
  0x23   : > { %p1743_p11 = pnand %p1199_p9, %p2117_p1 }
  0x25   : > { %p1296_p13 = pneg %p1743_p11 }
  0x28   : > { %s1294_s19 = scalar_lea.hbm %s2140_s4, 256 }
  0x29   : > { %p1295_p12 = scmp.ne.s32.totalorder %s2140_s4, %s1294_s19  ;;  %p1301_p5 = scmp.lt.u32.totalorder %s1294_s19, %s2140_s4 }
  0x2b   : > { %p1297_p0 = pnand %p1296_p13, %p1295_p12 }
  0x2d   : > { %p1298_p3 = pneg %p1297_p0 }
  0x2f   : > { %p1303_p7 = pnand %p1301_p5, %p1298_p3 }
  0x31   : > { %1306 = shalt.err (!%p1303_p7)
}
  0x32   : > { %s1307_s15 = scalar_lea.vmem %s1736_s20, 256  ;;  %p1315_p2 = scmp.lt.s32.totalorder %s1736_s20, %s1736_s20 }
  0x33   : > { %p1308_p9 = scmp.ne.s32.totalorder %s1736_s20, %s1307_s15  ;;  %p1316_p12 = scmp.lt.s32.totalorder %s1307_s15, %s1307_s15 }
  0x35   : > { %p1310_p10 = pnand %p1308_p9, %p1296_p13  ;;  %p1317_p0 = por %p1316_p12, %p1315_p2 }
  0x37   : > { %p1311_p1 = pneg %p1310_p10 }
  0x39   : > { %p1318_p6 = pnand %p1317_p0, %p1311_p1 }
  0x3b   : > { %1321 = shalt.err (!%p1318_p6)
}
  0x3c   : > { %s1600_s9 = smov 64   ;;  %s1601_s12 = smov 4  }
  0x3d   : > { %1202 = dma.hbm_to_vmem [thread:$0]  (!%p1743_p11), %s2140_s4, 256, %s1736_s20, [#allocation6], %s1600_s9, %s1600_s9, %s1601_s12  }
  0x3e   : > { %s2141_s8 = sld [smem:[#allocation31_spill]] }
  0x44   : > { %s1322_s19 = scalar_lea.hbm %s2141_s8, 256 }
  0x45   : > { %p1323_p2 = scmp.ne.s32.totalorder %s2141_s8, %s1322_s19  ;;  %p1329_p10 = scmp.lt.u32.totalorder %s1322_s19, %s2141_s8 }
  0x47   : > { %p1325_p1 = pnand %p1323_p2, %p1296_p13 }
  0x49   : > { %p1326_p6 = pneg %p1325_p1 }
  0x4b   : > { %p1331_p3 = pnand %p1329_p10, %p1326_p6 }
  0x4d   : > { %1334 = shalt.err (!%p1331_p3)
}
  0x4e   : > { %s1335_s20 = scalar_lea.vmem %s1747_s23, 256  ;;  %p1343_p12 = scmp.lt.s32.totalorder %s1747_s23, %s1747_s23 }
  0x4f   : > { %p1336_p5 = scmp.ne.s32.totalorder %s1747_s23, %s1335_s20  ;;  %p1344_p0 = scmp.lt.s32.totalorder %s1335_s20, %s1335_s20 }
  0x51   : > { %p1338_p7 = pnand %p1336_p5, %p1296_p13  ;;  %p1345_p2 = por %p1344_p0, %p1343_p12 }
  0x53   : > { %p1339_p9 = pneg %p1338_p7 }
  0x55   : > { %p1346_p1 = pnand %p1345_p2, %p1339_p9 }
  0x57   : > { %1349 = shalt.err (!%p1346_p1)
}
  0x58   : > { %1205 = dma.hbm_to_vmem [thread:$0]  (!%p1743_p11), %s2141_s8, 256, %s1747_s23, [#allocation9], %s1600_s9, %s1600_s9, %s1601_s12  }
  0x59   : > { %s52_s11 = sadd.s32 1, %s1592_s29  ;;  %s61_s25 = sadd.s32 1, %s1584_s27 }
  0x5a   : > { %p54_p13 = scmp.ge.s32.totalorder %s52_s11, 2  ;;  %p68_p6 = scmp.ne.s32.totalorder %s1584_s27, %s1580_s26 }
  0x5b   : > { %p69_p10 = scmp.eq.s32.totalorder %s1596_s30, 0  ;;  %p1228_p3 = scmp.lt.s32.totalorder %s1596_s30, 2 }
  0x5c   : > { %s2173_s11 = smov (%p54_p13, %s52_s11), 0  ;;  %p2143_p7 = scmp.eq.s32.totalorder %s1711_s14, 1 }
  0x5d   : > { %2142 = sst [smem:[#allocation26_spill]] %s2173_s11  ;;  %p70_p5 = por %p69_p10, %p68_p6 }
  0x5e   : > { %p1811_p9 = por %p2143_p7, %p68_p6  ;;  %s56_s17 = ssub.s32 %s1592_s29, %s2173_s11 }
  0x5f   : > { %s450_s22 = sand.u32 1, %s1584_s27   ;;  %p59_p12 = scmp.eq.s32.totalorder %s56_s17, 0 }
  0x60   : > { %s2144_s21 = scalar_select %p1811_p9, 1, 0 }
  0x61   : > { %s1818_s23 = sshll.u32 %s450_s22, 3  ;;  %s1110_s9 = sshll.u32 %s1592_s29, 7 }
  0x62   : > { %s1822_s12 = scalar_select %p59_p12, %s1584_s27, %s61_s25  }
  0x63   : > { %s2146_s0 = sld [smem:[#allocation28_spill]]  ;;  %s454_s20 = scalar_lea.vmem [#allocation2], %s1818_s23 }
  0x64   : > { %2145 = sst [smem:[#allocation27_spill]] %s1822_s12  ;;  %s462_s7 = sshll.u32 %s454_s20, 4  ;;  %s1836_s7 = int_to_ptr.vmem [resolvable:$true] %s462_s7 }
  0x65   : > { %p1832_p11 = pnand %p1228_p3, %p70_p5  ;;  %s1841_s24 = scalar_lea.hbm %s2100_s1, %s1110_s9 }
  0x66   : > { %s451_s19 = scalar_lea.sflag [#allocation3], %s450_s22 }
  0x67   : > { %p1352_p2 = pneg %p1832_p11 }
  0x69   : > { %s1827_s15 = scalar_lea.hbm %s2146_s0, %s1110_s9  ;;  %s1355_s11 = scalar_lea.hbm %s2146_s0, 256 }
  0x6a   : > { %s1350_s4 = scalar_lea.hbm %s1827_s15, 128  ;;  %p1356_p6 = scmp.lt.u32.totalorder %s1827_s15, %s2146_s0 }
  0x6b   : > { %p1351_p0 = scmp.ne.s32.totalorder %s1827_s15, %s1350_s4  ;;  %p1357_p10 = scmp.lt.u32.totalorder %s1355_s11, %s1350_s4 }
  0x6c   : > { %p1359_p5 = scmp.lt.u32.totalorder %s1350_s4, %s1827_s15 }
  0x6d   : > { %p1353_p1 = pnand %p1352_p2, %p1351_p0  ;;  %p1358_p3 = por %p1357_p10, %p1356_p6 }
  0x6f   : > { %p1354_p13 = pneg %p1353_p1  ;;  %p1360_p7 = por %p1359_p5, %p1358_p3 }
  0x71   : > { %p1361_p12 = pnand %p1360_p7, %p1354_p13 }
  0x73   : > { %1364 = shalt.err (!%p1361_p12)
}
  0x74   : > { %s1365_s22 = scalar_lea.vmem %s1836_s7, 128  ;;  %s1602_s8 = smov [#allocation2]  }
  0x75   : > { %p1366_p0 = scmp.ne.s32.totalorder %s1836_s7, %s1365_s22  ;;  %s1370_s9 = sshll.u32 %s1602_s8, 4  ;;  %s1371_s9 = int_to_ptr.vmem [resolvable:$false] %s1370_s9 }
  0x76   : > { %s1372_s29 = scalar_lea.vmem %s1371_s9, 256  ;;  %p1373_p4 = scmp.lt.s32.totalorder %s1836_s7, %s1371_s9 }
  0x77   : > { %p1368_p1 = pnand %p1366_p0, %p1352_p2  ;;  %p1374_p6 = scmp.lt.s32.totalorder %s1372_s29, %s1365_s22 }
  0x79   : > { %p1369_p9 = pneg %p1368_p1  ;;  %p1375_p10 = por %p1374_p6, %p1373_p4 }
  0x7b   : > { %p1376_p3 = pnand %p1375_p10, %p1369_p9 }
  0x7d   : > { %1379 = shalt.err (!%p1376_p3)
}
  0x7e   : > { %1209 = dma.hbm_to_vmem [thread:$0]  (!%p1832_p11), %s1827_s15, 128, %s1836_s7, %s451_s19  }
  0x7f   : > { %s469_s4 = sand.u32 1, %s1596_s30   ;;  %s473_s11 = scalar_lea.vmem [#allocation5], %s1818_s23 }
  0x80   : > { %s481_s12 = sshll.u32 %s473_s11, 4  ;;  %s470_s25 = scalar_lea.sflag [#allocation6], %s469_s4  ;;  %s482_s12 = int_to_ptr.vmem [resolvable:$true] %s481_s12 }
  0x81   : > { %s1380_s17 = scalar_lea.hbm %s1841_s24, 128  ;;  %s1385_s8 = scalar_lea.hbm %s2100_s1, 256 }
  0x82   : > { %p1381_p4 = scmp.ne.s32.totalorder %s1841_s24, %s1380_s17  ;;  %p1386_p5 = scmp.lt.u32.totalorder %s1841_s24, %s2100_s1 }
  0x83   : > { %p1387_p7 = scmp.lt.u32.totalorder %s1385_s8, %s1380_s17  ;;  %p1389_p0 = scmp.lt.u32.totalorder %s1380_s17, %s1841_s24 }
  0x84   : > { %p1383_p9 = pnand %p1381_p4, %p1352_p2 }
  0x85   : > { %p1388_p12 = por %p1387_p7, %p1386_p5 }
  0x86   : > { %p1384_p13 = pneg %p1383_p9 }
  0x87   : > { %p1390_p1 = por %p1389_p0, %p1388_p12 }
  0x89   : > { %p1391_p6 = pnand %p1390_p1, %p1384_p13 }
  0x8b   : > { %1394 = shalt.err (!%p1391_p6)
}
  0x8c   : > { %s1395_s23 = scalar_lea.vmem %s482_s12, 128  ;;  %s1603_s15 = smov [#allocation5]  }
  0x8d   : > { %p1396_p10 = scmp.ne.s32.totalorder %s482_s12, %s1395_s23  ;;  %s1400_s7 = sshll.u32 %s1603_s15, 4  ;;  %s1401_s7 = int_to_ptr.vmem [resolvable:$false] %s1400_s7 }
  0x8e   : > { %s1402_s19 = scalar_lea.vmem %s1401_s7, 256  ;;  %p1403_p9 = scmp.lt.s32.totalorder %s482_s12, %s1401_s7 }
  0x8f   : > { %p1398_p3 = pnand %p1396_p10, %p1352_p2  ;;  %p1404_p8 = scmp.lt.s32.totalorder %s1402_s19, %s1395_s23 }
  0x91   : > { %p1399_p4 = pneg %p1398_p3  ;;  %p1405_p5 = por %p1404_p8, %p1403_p9 }
  0x93   : > { %p1406_p7 = pnand %p1405_p5, %p1399_p4 }
  0x95   : > { %1409 = shalt.err (!%p1406_p7)
}
  0x96   : > { %1212 = dma.hbm_to_vmem [thread:$0]  (!%p1832_p11), %s1841_s24, 128, %s482_s12, %s470_s25  }
  0x97   : > { %p2148_p13 = scmp.ne.s32.totalorder %s2138_s18, 0 }
  0x98   : > { %s1892_s4 = sand.u32 (!%p2148_p13), 1, %s1580_s26   ;;  %p2149_p8 = scmp.ne.s32.totalorder (!%p2148_p13), %s2135_s16, 0 }
  0x99   : > { %490 = sbr.rel (%p2148_p13) target bundleno = 766 (0x2fe), region = 60  ;;  %s1895_s11 = sshll.u32 (!%p2148_p13), %s1892_s4, 3 }
  0x9a   : > { %s493_s17 = scalar_lea.sflag (!%p2148_p13), [#allocation3], %s1892_s4  ;;  %s496_s20 = scalar_lea.vmem (!%p2148_p13), [#allocation2], %s1895_s11 }
  0xa0   : > { %1547 = dma.done.wait (%p2149_p8), %s493_s17, 128  }
  0xa1   : > { %1549 = vsyncadd (%p2149_p8), %s493_s17, 4294967168  ;;  %s501_s18 = sand.u32 1, %s1711_s14   ;;  %s505_s24 = scalar_lea.vmem [#allocation5], %s1895_s11 }
  0xa2   : > { %s502_s10 = scalar_lea.sflag [#allocation6], %s501_s18 }
  0xa3   : > { %1551 = dma.done.wait (%p2149_p8), %s502_s10, 128  }
  0xa4   : > { %1553 = vsyncadd (%p2149_p8), %s502_s10, 4294967168  ;;  %p2150_p11 = scmp.eq.s32.totalorder %s1711_s14, 0 }
  0xa6   : > { %1555 = dma.done.wait (%p2150_p11), [#allocation6], 256   ;;  %p2151_p2 = pmov %p2150_p11 }
  0xa8   : > { %1557 = vsyncadd (%p2151_p2), [#allocation6], 4294967040  ;;  %p2152_p12 = pmov %p2151_p2 }
  0xa9   : > { %p2153_p0 = pmov %p2151_p2 }
  0xaa   : > { %1559 = dma.done.wait (%p2152_p12), [#allocation9], 256  }
  0xab   : > { %1561 = vsyncadd (%p2153_p0), [#allocation9], 4294967040  ;;  %v577_v0 = vld [vmem:[%s496_s20] sm:$0xff]  ;;  %v578_v1 = vld [vmem:[%s505_s24] sm:$0xff]  ;;  %vm580_vm0 = vcmask 261120   ;;  %v1604_v11 = vmov 0.0  }
  0xac   : > { %v579_v2 = vadd.f32 %v578_v1, %v577_v0  ;;  %v1286_v9 = vld [vmem:[#allocation7] sm:$0xff]   ;;  %1155 = vmatprep.subr.bf16.mxu0 %v1604_v11  ;;  %1163 = vmatprep.subr.bf16.mxu1 %v1604_v11  ;;  %v1288_v12 = vld [vmem:[#allocation7 + $0x8] sm:$0xff]   ;;  %vm1605_vm1 = vmmov 0   ;;  %v1290_v23 = vld [vmem:[#allocation8] sm:$0xff]   ;;  %s575_s15 = scalar_lea.vmem [#allocation14], %s1895_s11  ;;  %s1143_s7 = sshll.u32 %s1588_s28, 7 }
  0xad   : > { %v1287_v10 = vld [vmem:[%s2105_s6] sm:$0xff]   ;;  %1156 = vmatpush3.bf16.msra.mxu0 %v1286_v9  ;;  %v1289_v13 = vld [vmem:[%s2105_s6 + $0x8] sm:$0xff]   ;;  %1159 = vmatprep.mubr.msk.bf16.mxu0 %vm1605_vm1, %v1604_v11  ;;  %v1291_v25 = vld [vmem:[#allocation8 + $0x8] sm:$0xff]   ;;  %s1945_s20 = scalar_lea.hbm %s2112_s13, %s1143_s7  ;;  %s884_s10 = sshll.u32 %s575_s15, 4  ;;  %s885_s10 = int_to_ptr.vmem [resolvable:$true] %s884_s10 }
  0xae   : > { %v584_v3 = vsel %vm580_vm0, %v579_v2, 0.0  ;;  %1164 = vmatpush3.bf16.msra.mxu1 %v1287_v10  ;;  %1157 = vmatprep.subr.bf16.mxu0 %v1604_v11  ;;  %v1122_v18 = vld [vmem:[%s2101_s2] ss:$0 sm:$0xff]  ;;  %581 = vst.msk [vmem:[%s575_s15] sm:$0xff] %vm580_vm0, %v579_v2  ;;  %s828_s24 = scalar_lea.sflag [#allocation15], %s1892_s4  ;;  %s1410_s16 = scalar_lea.vmem %s885_s10, 128 }
  0xaf   : > { %585 = vadd.xlane.f32.xlu0 %v584_v3  ;;  %1165 = vmatprep.subr.bf16.mxu1 %v1604_v11  ;;  %v1123_v20 = vld [vmem:[%s2102_s3] ss:$0 sm:$0xff]  ;;  %p1411_p1 = scmp.ne.s32.totalorder %s885_s10, %s1410_s16  ;;  %p2154_p6 = scmp.ne.s32.totalorder %s2144_s21, 0 }
  0xb0   : > { %1167 = vmatprep.mubr.msk.bf16.mxu1 %vm1605_vm1, %v1604_v11  ;;  %s1606_s12 = smov [#allocation14]  }
  0xb1   : > { %1158 = vmatpush3.bf16.msra.mxu0 %v1288_v12  ;;  %p1412_p10 = pnand %p1411_p1, %p2154_p6  ;;  %s1414_s25 = sshll.u32 %s1606_s12, 4  ;;  %s1415_s25 = int_to_ptr.vmem [resolvable:$false] %s1414_s25 }
  0xb2   : > { %1166 = vmatpush3.bf16.msra.mxu1 %v1289_v13  ;;  %1171 = vmatprep.subr.bf16.mxu0 %v1604_v11  ;;  %s1416_s11 = scalar_lea.vmem %s1415_s25, 256  ;;  %p1417_p4 = scmp.lt.s32.totalorder %s885_s10, %s1415_s25 }
  0xb3   : > { %p1413_p3 = pneg %p1412_p10  ;;  %p1418_p9 = scmp.lt.s32.totalorder %s1416_s11, %s1410_s16 }
  0xb5   : > { %p1419_p5 = por %p1418_p9, %p1417_p4 }
  0xb7   : > { %p1420_p7 = pnand %p1419_p5, %p1413_p3 }
 0x13c   : > { %v586_v4 = vpop.xlane.xlu0 %585 }
 0x13d   : > { %v588_v5 = vmul.f32 0.03125, %v586_v4 }
 0x13f   : > { %v589_v6 = vsub.f32 %v579_v2, %v588_v5 }
 0x141   : > { %v590_v7 = vmul.f32 %v589_v6, %v589_v6 }
 0x143   : > { %v591_v8 = vsel %vm580_vm0, %v590_v7, 0.0 }
 0x144   : > { %592 = vadd.xlane.f32.xlu0 %v591_v8 }
 0x1d1   : > { %v593_v14 = vpop.xlane.xlu0 %592 }
 0x1d2   : > { %v594_v15 = vmul.f32 0.03125, %v593_v14 }
 0x1d4   : > { %v595_v16 = vadd.f32 1e-05, %v594_v15 }
 0x1d6   : > { %1292 = vrsqrt.f32 %v595_v16 }
 0x1e0   : > { %v1293_v17 = vpop.eup %1292 }
 0x1e1   : > { %v597_v19 = vmul.f32 %v1293_v17, %v589_v6 }
 0x1e3   : > { %v604_v21 = vmul.f32 %v1122_v18, %v597_v19 }
 0x1e5   : > { %v611_v22 = vadd.f32 %v1123_v20, %v604_v21 }
 0x1e7   : > { %v612_v24 = vpack.c.bf16 %v611_v22, %v611_v22 }
 0x1e9   : > { %1160 = vmatmul.mubr.msk.bf16.vlgmr.msra.gmra.mrb[0].mxu0 %vm580_vm0, %v612_v24  ;;  %1168 = vmatmul.mubr.msk.bf16.vlgmr.msra.gmra.mrb[0].mxu1 %vm580_vm0, %v612_v24 }
 0x1ea   : > { %1172 = vmatpush3.bf16.msra.mxu0 %v1290_v23  ;;  %1175 = vmatprep.mubr.msk.bf16.mxu0 %vm1605_vm1, %v1604_v11 }
 0x1eb   : > { %1173 = vmatprep.subr.bf16.mxu0 %v1604_v11 }
 0x1ee   : > { %1174 = vmatpush3.bf16.msra.mxu0 %v1291_v25 }
 0x1f1   : > { %1176 = vmatmul.mubr.msk.bf16.vlgmr.msra.gmra.mrb[4].mxu0 %vm580_vm0, %v612_v24 }
 0x1f2   : > { %1423 = shalt.err (!%p1420_p7)
}
 0x1f3   : > { %s1424_s22 = scalar_lea.hbm %s1945_s20, 128  ;;  %s1428_s29 = scalar_lea.hbm %s2112_s13, 256 }
 0x1f4   : > { %p1425_p13 = scmp.ne.s32.totalorder %s1945_s20, %s1424_s22  ;;  %p1429_p2 = scmp.lt.u32.totalorder %s1945_s20, %s2112_s13 }
 0x1f5   : > { %p1430_p12 = scmp.lt.u32.totalorder %s1428_s29, %s1424_s22  ;;  %p1432_p1 = scmp.lt.u32.totalorder %s1424_s22, %s1945_s20 }
 0x1f6   : > { %p1426_p8 = pnand %p1425_p13, %p2154_p6 }
 0x1f7   : > { %p1431_p0 = por %p1430_p12, %p1429_p2 }
 0x1f8   : > { %p1427_p11 = pneg %p1426_p8 }
 0x1f9   : > { %p1433_p10 = por %p1432_p1, %p1431_p0 }
 0x1fb   : > { %p1434_p3 = pnand %p1433_p10, %p1427_p11 }
 0x1fd   : > { %1437 = shalt.err (!%p1434_p3)
}
 0x1fe   : > { %1194 = dma.vmem_to_hbm [thread:$0]  (%p2154_p6), %s885_s10, 128, %s1945_s20, %s828_s24   ;;  %v1124_v26 = vld [vmem:[%s2104_s5] ss:$0 sm:$0xff]  ;;  %vm680_vm2 = vcmask 257024  }
 0x1ff   : > { %s1966_s7 = sshll.u32 %s1892_s4, 2  ;;  %s2155_s25 = sld [smem:[#allocation30_spill]] }
 0x200   : > { %s1975_s11 = sshll.u32 %s1588_s28, 6  ;;  %s561_s22 = scalar_lea.vmem [#allocation11], %s1966_s7 }
 0x201   : > { %s856_s8 = sshll.u32 %s561_s22, 4  ;;  %s554_s20 = scalar_lea.vmem [#allocation10], %s1966_s7  ;;  %s1985_s8 = int_to_ptr.vmem [resolvable:$true] %s856_s8 }
 0x202   : > { %s842_s10 = sshll.u32 %s554_s20, 4  ;;  %s2156_s9 = sld [smem:[#allocation34_spill]]  ;;  %s1993_s10 = int_to_ptr.vmem [resolvable:$true] %s842_s10 }
 0x203   : > { %s2157_s19 = sld [smem:[#allocation33_spill]]  ;;  %s2002_s24 = scalar_lea.sflag [#allocation12], %s501_s18 }
 0x204   : > { %s1438_s28 = scalar_lea.vmem %s1985_s8, 64  ;;  %s1607_s23 = smov [#allocation11]  }
 0x205   : > { %v1128_v27 = vld [vmem:[%s2155_s25] ss:$0 sm:$0xff]  ;;  %s2158_s25 = sld [smem:[#allocation32_spill]]  ;;  %p1439_p4 = scmp.ne.s32.totalorder %s1985_s8, %s1438_s28 }
 0x206   : > { %s1442_s15 = sshll.u32 %s1607_s23, 4  ;;  %s1443_s15 = int_to_ptr.vmem [resolvable:$false] %s1442_s15 }
 0x207   : > { %p1440_p9 = pnand %p1439_p4, %p2154_p6  ;;  %s1444_s0 = scalar_lea.vmem %s1443_s15, 128 }
 0x208   : > { %s1983_s29 = scalar_lea.hbm %s2156_s9, %s1975_s11  ;;  %p1445_p7 = scmp.lt.s32.totalorder %s1985_s8, %s1443_s15 }
 0x209   : > { %s1991_s17 = scalar_lea.hbm %s2157_s19, %s1975_s11  ;;  %p1441_p5 = pneg %p1440_p9 }
 0x20a   : > { %p1446_p13 = scmp.lt.s32.totalorder %s1444_s0, %s1438_s28 }
 0x20b   : > { %v1132_v40 = vld [vmem:[%s2158_s25] ss:$0 sm:$0xff] }
 0x20c   : > { %p1447_p8 = por %p1446_p13, %p1445_p7 }
 0x20e   : > { %p1448_p11 = pnand %p1447_p8, %p1441_p5 }
 0x2bc   : > { %v673_v28 = vpop.f32.mrb[0].mxu0  ;;  %v739_v29 = vpop.f32.mrb[0].mxu1 }
 0x2bd   : > { %v674_v30 = vadd.f32 %v1124_v26, %v673_v28  ;;  %v740_v31 = vadd.f32 %v1128_v27, %v739_v29  ;;  %v1161_v32 = vpop.f32.mrb[1].mxu0  ;;  %v1169_v33 = vpop.f32.mrb[1].mxu1 }
 0x2be   : > { %v676_v34 = vpop.f32.mrb[2].mxu0  ;;  %v742_v35 = vpop.f32.mrb[2].mxu1 }
 0x2bf   : > { %v679_v36 = vpack.c.bf16 %v674_v30, %v674_v30  ;;  %v745_v37 = vpack.c.bf16 %v740_v31, %v740_v31  ;;  %v1162_v38 = vpop.f32.mrb[3].mxu0  ;;  %v1170_v39 = vpop.f32.mrb[3].mxu1 }
 0x2c1   : > { %746 = vst.msk [vmem:[%s561_s22] sm:$0xf] %vm680_vm2, %v745_v37  ;;  %681 = vst.msk [vmem:[%s554_s20] sm:$0xf] %vm680_vm2, %v679_v36 }
 0x2c2   : > { %1451 = shalt.err (!%p1448_p11)
}
 0x2c3   : > { %s1452_s14 = scalar_lea.hbm %s1983_s29, 64  ;;  %s1456_s20 = scalar_lea.hbm %s2156_s9, 128 }
 0x2c4   : > { %p1453_p2 = scmp.ne.s32.totalorder %s1983_s29, %s1452_s14  ;;  %p1457_p1 = scmp.lt.u32.totalorder %s1983_s29, %s2156_s9 }
 0x2c5   : > { %p1458_p10 = scmp.lt.u32.totalorder %s1456_s20, %s1452_s14  ;;  %p1460_p4 = scmp.lt.u32.totalorder %s1452_s14, %s1983_s29 }
 0x2c6   : > { %p1454_p12 = pnand %p1453_p2, %p2154_p6 }
 0x2c7   : > { %p1459_p3 = por %p1458_p10, %p1457_p1 }
 0x2c8   : > { %p1455_p0 = pneg %p1454_p12 }
 0x2c9   : > { %p1461_p9 = por %p1460_p4, %p1459_p3 }
 0x2cb   : > { %p1462_p5 = pnand %p1461_p9, %p1455_p0 }
 0x2cd   : > { %1465 = shalt.err (!%p1462_p5)
}
 0x2ce   : > { %1192 = dma.vmem_to_hbm [thread:$0]  (%p2154_p6), %s1985_s8, 64, %s1983_s29, %s2002_s24  }
 0x2cf   : > { %s813_s0 = scalar_lea.sflag [#allocation4], %s1892_s4  ;;  %s1466_s25 = scalar_lea.vmem %s1993_s10, 64 }
 0x2d0   : > { %p1467_p7 = scmp.ne.s32.totalorder %s1993_s10, %s1466_s25  ;;  %s1608_s28 = smov [#allocation10]  }
 0x2d1   : > { %s1470_s23 = sshll.u32 %s1608_s28, 4  ;;  %s1471_s23 = int_to_ptr.vmem [resolvable:$false] %s1470_s23 }
 0x2d2   : > { %p1468_p13 = pnand %p1467_p7, %p2154_p6  ;;  %s1472_s15 = scalar_lea.vmem %s1471_s23, 128 }
 0x2d3   : > { %p1473_p11 = scmp.lt.s32.totalorder %s1993_s10, %s1471_s23  ;;  %p1474_p2 = scmp.lt.s32.totalorder %s1472_s15, %s1466_s25 }
 0x2d4   : > { %p1469_p8 = pneg %p1468_p13 }
 0x2d5   : > { %p1475_p12 = por %p1474_p2, %p1473_p11 }
 0x2d7   : > { %p1476_p0 = pnand %p1475_p12, %p1469_p8 }
 0x2d9   : > { %1479 = shalt.err (!%p1476_p0)
}
 0x2da   : > { %s1480_s4 = scalar_lea.hbm %s1991_s17, 64  ;;  %s1484_s14 = scalar_lea.hbm %s2157_s19, 128 }
 0x2db   : > { %p1481_p1 = scmp.ne.s32.totalorder %s1991_s17, %s1480_s4  ;;  %p1485_p4 = scmp.lt.u32.totalorder %s1991_s17, %s2157_s19 }
 0x2dc   : > { %p1486_p9 = scmp.lt.u32.totalorder %s1484_s14, %s1480_s4  ;;  %p1488_p7 = scmp.lt.u32.totalorder %s1480_s4, %s1991_s17 }
 0x2dd   : > { %p1482_p10 = pnand %p1481_p1, %p2154_p6 }
 0x2de   : > { %p1487_p5 = por %p1486_p9, %p1485_p4 }
 0x2df   : > { %p1483_p3 = pneg %p1482_p10 }
 0x2e0   : > { %p1489_p13 = por %p1488_p7, %p1487_p5 }
 0x2e2   : > { %p1490_p8 = pnand %p1489_p13, %p1483_p3 }
 0x2e4   : > { %1493 = shalt.err (!%p1490_p8)
}
 0x2e5   : > { %1191 = dma.vmem_to_hbm [thread:$0]  (%p2154_p6), %s1993_s10, 64, %s1991_s17, %s813_s0   ;;  %v804_v41 = vpop.f32.mrb[4].mxu0 }
 0x2e6   : > { %s568_s20 = scalar_lea.vmem [#allocation13], %s1966_s7  ;;  %v805_v42 = vadd.f32 %v1132_v40, %v804_v41  ;;  %v1177_v43 = vpop.f32.mrb[5].mxu0  ;;  %s2159_s28 = sld [smem:[#allocation35_spill]] }
 0x2e7   : > { %s870_s16 = sshll.u32 %s568_s20, 4  ;;  %v807_v44 = vpop.f32.mrb[6].mxu0  ;;  %s1609_s7 = smov [#allocation13]   ;;  %s871_s16 = int_to_ptr.vmem [resolvable:$true] %s870_s16 }
 0x2e8   : > { %v810_v45 = vpack.c.bf16 %v805_v42, %v805_v42  ;;  %v1178_v46 = vpop.f32.mrb[7].mxu0  ;;  %s1494_s4 = scalar_lea.vmem %s871_s16, 64  ;;  %s1498_s10 = sshll.u32 %s1609_s7, 4  ;;  %s1499_s10 = int_to_ptr.vmem [resolvable:$false] %s1498_s10 }
 0x2e9   : > { %p1495_p11 = scmp.ne.s32.totalorder %s871_s16, %s1494_s4  ;;  %s1500_s17 = scalar_lea.vmem %s1499_s10, 128 }
 0x2ea   : > { %811 = vst.msk [vmem:[%s568_s20] sm:$0xf] %vm680_vm2, %v810_v45  ;;  %p1501_p0 = scmp.lt.s32.totalorder %s871_s16, %s1499_s10  ;;  %p1502_p1 = scmp.lt.s32.totalorder %s1500_s17, %s1494_s4 }
 0x2eb   : > { %p1496_p2 = pnand %p1495_p11, %p2154_p6 }
 0x2ec   : > { %s2160_s23 = smov %s2159_s28  ;;  %s2053_s15 = scalar_lea.hbm %s2159_s28, %s1975_s11 }
 0x2ed   : > { %p1497_p12 = pneg %p1496_p2  ;;  %p1503_p10 = por %p1502_p1, %p1501_p0 }
 0x2ef   : > { %p1504_p3 = pnand %p1503_p10, %p1497_p12 }
 0x2f1   : > { %1507 = shalt.err (!%p1504_p3)
}
 0x2f2   : > { %s1508_s11 = scalar_lea.hbm %s2053_s15, 64  ;;  %s1512_s29 = scalar_lea.hbm %s2160_s23, 128 }
 0x2f3   : > { %p1509_p4 = scmp.ne.s32.totalorder %s2053_s15, %s1508_s11  ;;  %p1513_p7 = scmp.lt.u32.totalorder %s2053_s15, %s2160_s23 }
 0x2f4   : > { %p1514_p13 = scmp.lt.u32.totalorder %s1512_s29, %s1508_s11  ;;  %p1516_p11 = scmp.lt.u32.totalorder %s1508_s11, %s2053_s15 }
 0x2f5   : > { %p1510_p9 = pnand %p1509_p4, %p2154_p6 }
 0x2f6   : > { %p1515_p8 = por %p1514_p13, %p1513_p7 }
 0x2f7   : > { %p1511_p5 = pneg %p1510_p9 }
 0x2f8   : > { %p1517_p2 = por %p1516_p11, %p1515_p8 }
 0x2fa   : > { %p1518_p12 = pnand %p1517_p2, %p1511_p5 }
 0x2fc   : > { %1521 = shalt.err (!%p1518_p12)
}
 0x2fd   : > { %1193 = dma.vmem_to_hbm [thread:$0]  (%p2154_p6), %s871_s16, 64, %s2053_s15, %s2002_s24  }
 0x2fe PF: > { %s2161_s22 = sld [smem:[#allocation23_spill]]  ;;  %s2162_s20 = sld [smem:[#allocation25_spill]] }
 0x2ff   : > { %p2164_p1 = scmp.ge.s32.totalorder %s1596_s30, 2 }
 0x304   : > { %s896_s12 = sand.u32 1, %s2161_s22   ;;  %p2163_p0 = scmp.ne.s32.totalorder %s2162_s20, 0 }
 0x305   : > { %s897_s25 = scalar_lea.sflag [#allocation4], %s896_s12 }
 0x306   : > { %p1214_p10 = pnand %p2164_p1, %p2163_p0 }
 0x308   : > { %1563 = dma.done.wait (!%p1214_p10), %s897_s25, 64  }
 0x309   : > { %1565 = vsyncadd (!%p1214_p10), %s897_s25, 4294967232  ;;  %s2165_s28 = sadd.s32 4294967294, %s1596_s30  }
 0x30a   : > { %s905_s4 = sand.u32 1, %s2165_s28  }
 0x30b   : > { %s906_s7 = scalar_lea.sflag [#allocation12], %s905_s4 }
 0x30c   : > { %1567 = dma.done.wait (!%p1214_p10), %s906_s7, 128  }
 0x30d   : > { %1569 = vsyncadd (!%p1214_p10), %s906_s7, 4294967168  ;;  %s924_s21 = scalar_lea.sflag [#allocation15], %s896_s12 }
 0x30e   : > { %1571 = dma.done.wait (!%p1214_p10), %s924_s21, 128  }
 0x30f   : > { %1573 = vsyncadd (!%p1214_p10), %s924_s21, 4294967168  ;;  %s40_s30 = sadd.s32 1, %s1596_s30   ;;  %s2166_s24 = sld [smem:[#allocation27_spill]] }
 0x310   : > { %p37_p6 = scmp.ge.s32.totalorder %s40_s30, 4   ;;  %s2167_s28 = sld [smem:[#allocation24_spill]] }
 0x311   : > { %s2168_s29 = sld [smem:[#allocation26_spill]]  ;;  %s2169_s25 = smov %s1580_s26 }
 0x312   : > { %s2170_s26 = smov %s1584_s27  ;;  %39 = sbr.rel (!%p37_p6) target bundleno = 22 (0x16), region = 175 }
 0x315   : > { %s2171_s27 = smov %s2166_s24 }
 0x319   :  { %929 = vsyncpa [#allocation3], 1 }
 0x31a   :  { %931 = vsyncpa [#allocation3 + $0x1], 1 }
 0x31b   :  { %932 = vsyncpa [#allocation6], 1 }
 0x31c   :  { %934 = vsyncpa [#allocation6 + $0x1], 1 }
 0x31d   :  { %935 = vsyncpa [#allocation9], 1 }
 0x31e   :  { %936 = vsyncpa [#allocation4], 1 }
 0x31f   :  { %938 = vsyncpa [#allocation4 + $0x1], 1 }
 0x320   :  { %939 = vsyncpa [#allocation12], 1 }
 0x321   :  { %941 = vsyncpa [#allocation12 + $0x1], 1 }
 0x322   :  { %942 = vsyncpa [#allocation15], 1 }
 0x323   :  { %944 = vsyncpa [#allocation15 + $0x1], 1 }

</bundles_post_ra>
